<compile_context>
chip_gen: v7x
topology: tpu7x:2x2x1
jax: 0.10.0
libtpu: 0.0.40
codegen_flags: <defaults>
</compile_context>

<pallas_src>
import jax
import jax.numpy as jnp
from jax.experimental import pallas as pl
from jax.experimental.pallas import tpu as pltpu


HALO = 7  # cumulative one-sided receptive field of the three dilated convs (1+2+4)


def _tpu_generation():
    """Best-effort TPU generation (0 if unknown / non-TPU)."""
    try:
        dev = jax.devices()[0]
        if dev.platform != "tpu":
            return 0
        kind = dev.device_kind.lower()
    except Exception:
        return 0
    for g in (7, 6, 5, 4, 3, 2):
        if (f"v{g}" in kind) or (f"{g}x" in kind) or (f"{g}e" in kind) or (f"{g}p" in kind):
            return g
    return 0


def _leaky(h):
    return jnp.where(h >= 0, h, 0.2 * h)


def _conv3_valid(a, w_cat, b, d):
    """'valid' 3-tap dilated conv as ONE fused bf16 MXU matmul (f32 accumulation).

    a:     (C, Wa)     activations (already zero wherever the column is outside [0, size))
    w_cat: (Cout, 3*C) bf16, taps concatenated [t-d | t | t+d] along the contraction dim
    b:     (Cout, 1)   f32 bias
    returns (Cout, Wa - 2*d) f32
    """
    a = a.astype(jnp.bfloat16)          # cast the (C, Wa) activation once; the tap
    Wo = a.shape[1] - 2 * d             # stack below is built from bf16 slices.
    taps = jnp.concatenate(
        [a[:, 0:Wo], a[:, d:d + Wo], a[:, 2 * d:2 * d + Wo]], axis=0)   # (3C, Wo) bf16
    return jnp.dot(w_cat, taps, preferred_element_type=jnp.float32) + b


def dblock_forward(x, params, factor, *, tile_t=None, out_dtype=jnp.float32):
    """x: (B, Cin, T) float32 (PyTorch NCL).  Returns (B, Cout, T // factor)."""
    B, Cin, T = x.shape
    size = T // factor
    Cout = params['res_w'].shape[0]
    Cin_p = ((Cin + 7) // 8) * 8        # sublane-align the layer-0 tap pieces

    # ---- generation-aware knobs ----------------------------------------------------
    gen = _tpu_generation()
    if gen >= 7:                        # v7x: 64 MiB VMEM per TensorCore
        vmem_cap, default_tile = 40 << 20, 1024
    elif gen in (5, 6):                 # v5e / v6e: 128 MiB VMEM
        vmem_cap, default_tile = 64 << 20, 2048
    else:                               # unknown / older: stay conservative
        vmem_cap, default_tile = 32 << 20, 1024
    # bf16 elementwise only where the VPU supports it (v6e / v7x); f32 on v5e & older
    ew_dtype = jnp.bfloat16 if gen in (0, 6, 7) else jnp.float32
    out_itemsize = jnp.dtype(out_dtype).itemsize

    def vmem_est(tile):
        n = pl.cdiv(size, tile)
        lp = n * tile + 2 * HALO
        win_ = tile + 2 * HALO
        w_b = (2 * 2 * (Cout * Cin_p + 3 * Cin_p * Cout + 2 * 3 * Cout * Cout)
               + 2 * 4 * (4 * Cout))
        return (2 * Cin_p * lp * 2            # resident bf16 row (double-buffered)
                + 2 * Cout * tile * out_itemsize
                + w_b
                + 14 * Cout * win_ * 4        # in-kernel intermediates (f32-equivalent)
                + (4 << 20))                  # headroom

    # ---- nearest-neighbour downsample (matches F.interpolate(mode='nearest')) ------
    if T % factor == 0:
        x_ds = x[:, :, ::factor]                       # idx = i * factor
    else:
        idx = (jnp.arange(size) * T) // size           # general floor formula
        x_ds = x[:, :, idx]

    # ---- time tiling ----------------------------------------------------------------
    if tile_t is None:
        if size <= 2 * default_tile and vmem_est(size) <= vmem_cap:
            tile_t = size                              # single-tile fast path (n_t == 1)
        else:
            tile_t = default_tile
            while tile_t > 256 and vmem_est(tile_t) > vmem_cap:
                tile_t //= 2
    n_t = pl.cdiv(size, tile_t)
    size_pad = n_t * tile_t
    assert tile_t == size_pad or tile_t % 128 == 0, "tile_t must be full or 128-aligned"

    Lp = size_pad + 2 * HALO
    win = tile_t + 2 * HALO                            # per-tile input window (with halo)
    # TODO(synk): for very large Cin*size (stacked DBlocks with Cin = hidden on v7x),
    # switch the input to memory_space=pl.ANY and manually double-buffer
    # (Cin, tile_t + 2*HALO) halo windows with pltpu.make_async_copy instead of keeping
    # the whole padded row resident in VMEM.
    assert 2 * Cin_p * Lp * 2 <= vmem_cap, (
        "resident input row exceeds the VMEM budget; windowed-DMA fallback needed")

    # zero halo on both ends (+ right padding up to size_pad); halo zeros reproduce the
    # per-layer zero padding at the sequence ends, interior tiles pick up real neighbour
    # samples from the resident row.  Zero-padded channels contribute nothing.
    x_pad = jnp.pad(x_ds, ((0, 0), (0, Cin_p - Cin), (HALO, HALO + size_pad - size)))
    x_pad = x_pad.astype(jnp.bfloat16)                 # halve DMA / VMEM of resident row

    # ---- weights: channels-first, 3 taps fused along the contraction dim, bf16 -----
    def pad_in(w):                       # zero-pad the input-channel axis up to Cin_p
        return jnp.pad(w, ((0, 0), (0, Cin_p - Cin), (0, 0)))

    def cat3(w):                         # (Cout, C, 3) -> (Cout, 3*C), taps [t-d|t|t+d]
        return jnp.concatenate([w[:, :, 0], w[:, :, 1], w[:, :, 2]],
                               axis=1).astype(jnp.bfloat16)

    wr = jnp.pad(params['res_w'][:, :, 0],
                 ((0, 0), (0, Cin_p - Cin))).astype(jnp.bfloat16)       # (Cout, Cin_p)
    br = params['res_b'][:, None].astype(jnp.float32)                   # (Cout, 1)
    w0, b0 = cat3(pad_in(params['conv0_w'])), params['conv0_b'][:, None].astype(jnp.float32)
    w1, b1 = cat3(params['conv1_w']), params['conv1_b'][:, None].astype(jnp.float32)
    w2, b2 = cat3(params['conv2_w']), params['conv2_b'][:, None].astype(jnp.float32)

    def kernel(x_ref, wr_ref, br_ref, w0_ref, b0_ref, w1_ref, b1_ref,
               w2_ref, b2_ref, o_ref):
        t = pl.program_id(1)
        start = pl.multiple_of(t * tile_t, tile_t)     # offset into the padded row

        # (Cin_p, win) window; global time index of column j is start + j - HALO
        if n_t == 1:
            xw = x_ref[0]                              # whole (padded) row == the window
        else:
            xw = x_ref[0, :, pl.ds(start, win)]

        # ONE shared (1, win) column-index row; masks slice it (no (Cout, W) iotas)
        col = jax.lax.broadcasted_iota(jnp.int32, (1, win), 1) + (start - HALO)

        def mask(a, off):
            c = col[:, off:off + a.shape[1]]
            keep = jnp.logical_and(c >= 0, c < size)
            return jnp.where(keep, a, jnp.zeros((), a.dtype))

        # residual branch: 1x1 conv == plain channel matmul on the un-haloed window
        xc = xw[:, HALO:HALO + tile_t]
        residual = jnp.dot(wr_ref[...], xc,
                           preferred_element_type=jnp.float32) + br_ref[...]

        # main branch: leaky_relu -> dilated "valid" conv over the shrinking halo.
        # Halo columns outside [0, size) are zero in xw and leaky(0) == 0, so layer 0
        # needs no mask; later layers mask to reproduce PyTorch's per-layer zero padding
        # exactly (the biases make halo columns non-zero after each conv).
        a = _leaky(xw.astype(ew_dtype))                         # width win
        h = _conv3_valid(a, w0_ref[...], b0_ref[...], 1)        # width win - 2
        a = mask(_leaky(h.astype(ew_dtype)), 1)
        h = _conv3_valid(a, w1_ref[...], b1_ref[...], 2)        # width win - 6
        a = mask(_leaky(h.astype(ew_dtype)), 3)
        h = _conv3_valid(a, w2_ref[...], b2_ref[...], 4)        # width tile_t

        o_ref[0] = (h + residual).astype(o_ref.dtype)

    def full(shape):
        return pl.BlockSpec(shape, lambda b, t: (0,) * len(shape))

    flops = 2 * B * size * (Cout * Cin_p + 3 * Cin_p * Cout + 2 * 3 * Cout * Cout)
    bytes_accessed = (x_pad.size * 2 + B * size_pad * Cout * out_itemsize
                      + (wr.size + w0.size + w1.size + w2.size) * 2
                      + (br.size + b0.size + b1.size + b2.size) * 4)
    vmem_limit = int(min(vmem_cap, max(vmem_est(tile_t), 16 << 20)))

    out = pl.pallas_call(
        kernel,
        out_shape=jax.ShapeDtypeStruct((B, Cout, size_pad), out_dtype),
        grid=(B, n_t),
        in_specs=[
            pl.BlockSpec((1, Cin_p, Lp), lambda b, t: (b, 0, 0)),   # resident per-batch row
            full((Cout, Cin_p)), full((Cout, 1)),                   # residual 1x1
            full((Cout, 3 * Cin_p)), full((Cout, 1)),               # conv0 d=1 (taps fused)
            full((Cout, 3 * Cout)), full((Cout, 1)),                # conv1 d=2
            full((Cout, 3 * Cout)), full((Cout, 1)),                # conv2 d=4
        ],
        out_specs=pl.BlockSpec((1, Cout, tile_t), lambda b, t: (b, 0, t)),
        compiler_params=pltpu.CompilerParams(
            dimension_semantics=("parallel", "parallel"),
            vmem_limit_bytes=vmem_limit),
        cost_estimate=pl.CostEstimate(flops=int(flops), transcendentals=0,
                                      bytes_accessed=int(bytes_accessed)),
    )(x_pad, wr, br, w0, b0, w1, b1, w2, b2)

    return out[:, :, :size]


# ------------------------------------------------------------------------------
# deterministic parameter init (matches nn.init.orthogonal_ shapes; biases made
# non-zero here to exercise the boundary-padding path of the kernel)
# ------------------------------------------------------------------------------
def orthogonal(key, out_ch, in_ch, k):
    rows, cols = out_ch, in_ch * k
    a = jax.random.normal(key, (max(rows, cols), min(rows, cols)), jnp.float32)
    q, r = jnp.linalg.qr(a)
    q = q * jnp.sign(jnp.diagonal(r))[None, :]
    if rows < cols:
        q = q.T
    return q[:rows, :cols].reshape(out_ch, in_ch, k)


def make_params(key, cin, ch):
    ks = jax.random.split(key, 9)
    return {
        'res_w':   orthogonal(ks[0], ch, cin, 1),
        'res_b':   0.1 * jax.random.normal(ks[1], (ch,), jnp.float32),
        'conv0_w': orthogonal(ks[2], ch, cin, 3),
        'conv0_b': 0.1 * jax.random.normal(ks[3], (ch,), jnp.float32),
        'conv1_w': orthogonal(ks[4], ch, ch, 3),
        'conv1_b': 0.1 * jax.random.normal(ks[5], (ch,), jnp.float32),
        'conv2_w': orthogonal(ks[6], ch, ch, 3),
        'conv2_b': 0.1 * jax.random.normal(ks[7], (ch,), jnp.float32),
    }, ks[8]


# ------------------------------------------------------------------------------
# pure-JAX reference (lax.conv_general_dilated) for correctness check
# ------------------------------------------------------------------------------
def ref_dblock(x, params, factor):
    B, Cin, T = x.shape
    size = T // factor
    idx = (jnp.arange(size) * T) // size

    def conv1d(h, w, b, dil, pad):
        out = jax.lax.conv_general_dilated(
            h, w, window_strides=(1,), padding=[(pad, pad)],
            rhs_dilation=(dil,), dimension_numbers=('NCH', 'OIH', 'NCH'),
            precision=jax.lax.Precision.HIGHEST)
        return out + b[None, :, None]

    residual = conv1d(x, params['res_w'], params['res_b'], 1, 0)[:, :, idx]
    h = x[:, :, idx]
    for name, d in (('conv0', 1), ('conv1', 2), ('conv2', 4)):
        h = jnp.where(h >= 0, h, 0.2 * h)
        h = conv1d(h, params[name + '_w'], params[name + '_b'], d, d)
    return h + residual


if __name__ == "__main__":
    # primary check: small shapes implied by the module (B=2, Cin=4, hidden=32, T=16)
    B, input_size, hidden_size, T, factor = 2, 4, 32, 16, 2
    params, kx = make_params(jax.random.PRNGKey(0), input_size, hidden_size)
    x = jax.random.normal(kx, (B, input_size, T), jnp.float32)

    out = jax.block_until_ready(dblock_forward(x, params, factor))
    ref = ref_dblock(x, params, factor)
    assert out.shape == (B, hidden_size, T // factor), out.shape
    assert jnp.allclose(out, ref, atol=3e-2, rtol=3e-2), \
        float(jnp.max(jnp.abs(out - ref)))

    # secondary check: longer sequence exercising the multi-tile halo/mask path
    T2 = 512
    params2, kx2 = make_params(jax.random.PRNGKey(1), input_size, hidden_size)
    x2 = jax.random.normal(kx2, (B, input_size, T2), jnp.float32)
    out2 = jax.block_until_ready(dblock_forward(x2, params2, factor, tile_t=128))
    ref2 = ref_dblock(x2, params2, factor)
    assert out2.shape == (B, hidden_size, T2 // factor), out2.shape
    assert jnp.allclose(out2, ref2, atol=3e-2, rtol=3e-2), \
        float(jnp.max(jnp.abs(out2 - ref2)))

    print("KERNEL_OK")
</pallas_src>

<mosaic_0001>
module attributes {stable_mosaic.version = 11 : i64} {
  func.func @kernel(%arg0: i32, %arg1: i32, %arg2: memref<1x8x22xbf16, #tpu.memory_space<vmem>>, %arg3: memref<32x8xbf16, #tpu.memory_space<vmem>>, %arg4: memref<32x1xf32, #tpu.memory_space<vmem>>, %arg5: memref<32x24xbf16, #tpu.memory_space<vmem>>, %arg6: memref<32x1xf32, #tpu.memory_space<vmem>>, %arg7: memref<32x96xbf16, #tpu.memory_space<vmem>>, %arg8: memref<32x1xf32, #tpu.memory_space<vmem>>, %arg9: memref<32x96xbf16, #tpu.memory_space<vmem>>, %arg10: memref<32x1xf32, #tpu.memory_space<vmem>>, %arg11: memref<1x32x8xf32, #tpu.memory_space<vmem>>) attributes {dimension_semantics = [#tpu.dimension_semantics<parallel>, #tpu.dimension_semantics<parallel>], iteration_bounds = array<i64: 2, 1>, scalar_prefetch = 0 : i64, scratch_operands = 0 : i64, tpu.core_type = #tpu.core_type<tc>, window_params = [{transform_indices = @transform_0, window_bounds = array<i64: 1, 8, 22>}, {pipeline_mode = #tpu.pipeline_mode<synchronous>, transform_indices = @transform_1, window_bounds = array<i64: 32, 8>}, {pipeline_mode = #tpu.pipeline_mode<synchronous>, transform_indices = @transform_2, window_bounds = array<i64: 32, 1>}, {pipeline_mode = #tpu.pipeline_mode<synchronous>, transform_indices = @transform_3, window_bounds = array<i64: 32, 24>}, {pipeline_mode = #tpu.pipeline_mode<synchronous>, transform_indices = @transform_4, window_bounds = array<i64: 32, 1>}, {pipeline_mode = #tpu.pipeline_mode<synchronous>, transform_indices = @transform_5, window_bounds = array<i64: 32, 96>}, {pipeline_mode = #tpu.pipeline_mode<synchronous>, transform_indices = @transform_6, window_bounds = array<i64: 32, 1>}, {pipeline_mode = #tpu.pipeline_mode<synchronous>, transform_indices = @transform_7, window_bounds = array<i64: 32, 96>}, {pipeline_mode = #tpu.pipeline_mode<synchronous>, transform_indices = @transform_8, window_bounds = array<i64: 32, 1>}, {transform_indices = @transform_9, window_bounds = array<i64: 1, 32, 8>}]} {
    %c8_i32 = arith.constant 8 : i32
    %0 = arith.muli %arg1, %c8_i32 : i32
    %1 = tpu.assume_multiple %0, 8 : i32
    %c0 = arith.constant 0 : index
    %c0_0 = arith.constant 0 : index
    %c0_1 = arith.constant 0 : index
    %2 = vector.load %arg2[%c0, %c0_0, %c0_1] : memref<1x8x22xbf16, #tpu.memory_space<vmem>>, vector<1x8x22xbf16>
    %3 = vector.shape_cast %2 : vector<1x8x22xbf16> to vector<8x22xbf16>
    %4 = tpu.iota {dimensions = array<i32: 1>} : vector<1x22xi32>
    %c7_i32 = arith.constant 7 : i32
    %5 = arith.subi %1, %c7_i32 : i32
    %6 = vector.broadcast %5 : i32 to vector<1x22xi32>
    %7 = arith.addi %4, %6 : vector<1x22xi32>
    %8 = vector.extract_strided_slice %3 {offsets = [0, 7], sizes = [8, 8], strides = [1, 1]} : vector<8x22xbf16> to vector<8x8xbf16>
    %c0_2 = arith.constant 0 : index
    %c0_3 = arith.constant 0 : index
    %9 = vector.load %arg3[%c0_2, %c0_3] : memref<32x8xbf16, #tpu.memory_space<vmem>>, vector<32x8xbf16>
    %cst = arith.constant dense<0.000000e+00> : vector<32x8xf32>
    %10 = tpu.matmul %9, %8, %cst {dimension_numbers = #tpu.dot_dimension_numbers<[1], [0], [0], [1], [0, 0, 1, 1], [], []>} : vector<32x8xbf16>, vector<8x8xbf16>, vector<32x8xf32> -> vector<32x8xf32>
    %c0_4 = arith.constant 0 : index
    %c0_5 = arith.constant 0 : index
    %11 = vector.load %arg4[%c0_4, %c0_5] : memref<32x1xf32, #tpu.memory_space<vmem>>, vector<32x1xf32>
    %12 = vector.broadcast %11 : vector<32x1xf32> to vector<32x8xf32>
    %13 = arith.addf %10, %12 : vector<32x8xf32>
    %cst_6 = arith.constant 0.000000e+00 : bf16
    %14 = vector.broadcast %cst_6 : bf16 to vector<8x22xbf16>
    %15 = arith.cmpf oge, %3, %14 : vector<8x22xbf16>
    %cst_7 = arith.constant 2.001950e-01 : bf16
    %16 = vector.broadcast %cst_7 : bf16 to vector<8x22xbf16>
    %17 = arith.mulf %16, %3 : vector<8x22xbf16>
    %18 = arith.select %15, %3, %17 : vector<8x22xi1>, vector<8x22xbf16>
    %c0_8 = arith.constant 0 : index
    %c0_9 = arith.constant 0 : index
    %19 = vector.load %arg5[%c0_8, %c0_9] : memref<32x24xbf16, #tpu.memory_space<vmem>>, vector<32x24xbf16>
    %c0_10 = arith.constant 0 : index
    %c0_11 = arith.constant 0 : index
    %20 = vector.load %arg6[%c0_10, %c0_11] : memref<32x1xf32, #tpu.memory_space<vmem>>, vector<32x1xf32>
    %21 = vector.extract_strided_slice %18 {offsets = [0, 0], sizes = [8, 20], strides = [1, 1]} : vector<8x22xbf16> to vector<8x20xbf16>
    %22 = vector.extract_strided_slice %18 {offsets = [0, 1], sizes = [8, 20], strides = [1, 1]} : vector<8x22xbf16> to vector<8x20xbf16>
    %23 = vector.extract_strided_slice %18 {offsets = [0, 2], sizes = [8, 20], strides = [1, 1]} : vector<8x22xbf16> to vector<8x20xbf16>
    %24 = tpu.concatenate %21, %22, %23 in 0 : vector<8x20xbf16>, vector<8x20xbf16>, vector<8x20xbf16> -> vector<24x20xbf16>
    %cst_12 = arith.constant dense<0.000000e+00> : vector<32x20xf32>
    %25 = tpu.matmul %19, %24, %cst_12 {dimension_numbers = #tpu.dot_dimension_numbers<[1], [0], [0], [1], [0, 0, 1, 1], [], []>} : vector<32x24xbf16>, vector<24x20xbf16>, vector<32x20xf32> -> vector<32x20xf32>
    %26 = vector.broadcast %20 : vector<32x1xf32> to vector<32x20xf32>
    %27 = arith.addf %25, %26 : vector<32x20xf32>
    %28 = arith.truncf %27 : vector<32x20xf32> to vector<32x20xbf16>
    %cst_13 = arith.constant 0.000000e+00 : bf16
    %29 = vector.broadcast %cst_13 : bf16 to vector<32x20xbf16>
    %30 = arith.cmpf oge, %28, %29 : vector<32x20xbf16>
    %cst_14 = arith.constant 2.001950e-01 : bf16
    %31 = vector.broadcast %cst_14 : bf16 to vector<32x20xbf16>
    %32 = arith.mulf %31, %28 : vector<32x20xbf16>
    %33 = arith.select %30, %28, %32 : vector<32x20xi1>, vector<32x20xbf16>
    %34 = vector.extract_strided_slice %7 {offsets = [0, 1], sizes = [1, 20], strides = [1, 1]} : vector<1x22xi32> to vector<1x20xi32>
    %c0_i32 = arith.constant 0 : i32
    %35 = vector.broadcast %c0_i32 : i32 to vector<1x20xi32>
    %36 = arith.cmpi sge, %34, %35 : vector<1x20xi32>
    %c8_i32_15 = arith.constant 8 : i32
    %37 = vector.broadcast %c8_i32_15 : i32 to vector<1x20xi32>
    %38 = arith.cmpi slt, %34, %37 : vector<1x20xi32>
    %39 = arith.andi %36, %38 : vector<1x20xi1>
    %cst_16 = arith.constant 0.000000e+00 : bf16
    %40 = vector.shape_cast %39 : vector<1x20xi1> to vector<1x20xi1>
    %41 = vector.broadcast %40 : vector<1x20xi1> to vector<32x20xi1>
    %42 = vector.broadcast %cst_16 : bf16 to vector<32x20xbf16>
    %43 = arith.select %41, %33, %42 : vector<32x20xi1>, vector<32x20xbf16>
    %c0_17 = arith.constant 0 : index
    %c0_18 = arith.constant 0 : index
    %44 = vector.load %arg7[%c0_17, %c0_18] : memref<32x96xbf16, #tpu.memory_space<vmem>>, vector<32x96xbf16>
    %c0_19 = arith.constant 0 : index
    %c0_20 = arith.constant 0 : index
    %45 = vector.load %arg8[%c0_19, %c0_20] : memref<32x1xf32, #tpu.memory_space<vmem>>, vector<32x1xf32>
    %46 = vector.extract_strided_slice %43 {offsets = [0, 0], sizes = [32, 16], strides = [1, 1]} : vector<32x20xbf16> to vector<32x16xbf16>
    %47 = vector.extract_strided_slice %43 {offsets = [0, 2], sizes = [32, 16], strides = [1, 1]} : vector<32x20xbf16> to vector<32x16xbf16>
    %48 = vector.extract_strided_slice %43 {offsets = [0, 4], sizes = [32, 16], strides = [1, 1]} : vector<32x20xbf16> to vector<32x16xbf16>
    %49 = tpu.concatenate %46, %47, %48 in 0 : vector<32x16xbf16>, vector<32x16xbf16>, vector<32x16xbf16> -> vector<96x16xbf16>
    %cst_21 = arith.constant dense<0.000000e+00> : vector<32x16xf32>
    %50 = tpu.matmul %44, %49, %cst_21 {dimension_numbers = #tpu.dot_dimension_numbers<[1], [0], [0], [1], [0, 0, 1, 1], [], []>} : vector<32x96xbf16>, vector<96x16xbf16>, vector<32x16xf32> -> vector<32x16xf32>
    %51 = vector.broadcast %45 : vector<32x1xf32> to vector<32x16xf32>
    %52 = arith.addf %50, %51 : vector<32x16xf32>
    %53 = arith.truncf %52 : vector<32x16xf32> to vector<32x16xbf16>
    %cst_22 = arith.constant 0.000000e+00 : bf16
    %54 = vector.broadcast %cst_22 : bf16 to vector<32x16xbf16>
    %55 = arith.cmpf oge, %53, %54 : vector<32x16xbf16>
    %cst_23 = arith.constant 2.001950e-01 : bf16
    %56 = vector.broadcast %cst_23 : bf16 to vector<32x16xbf16>
    %57 = arith.mulf %56, %53 : vector<32x16xbf16>
    %58 = arith.select %55, %53, %57 : vector<32x16xi1>, vector<32x16xbf16>
    %59 = vector.extract_strided_slice %7 {offsets = [0, 3], sizes = [1, 16], strides = [1, 1]} : vector<1x22xi32> to vector<1x16xi32>
    %c0_i32_24 = arith.constant 0 : i32
    %60 = vector.broadcast %c0_i32_24 : i32 to vector<1x16xi32>
    %61 = arith.cmpi sge, %59, %60 : vector<1x16xi32>
    %c8_i32_25 = arith.constant 8 : i32
    %62 = vector.broadcast %c8_i32_25 : i32 to vector<1x16xi32>
    %63 = arith.cmpi slt, %59, %62 : vector<1x16xi32>
    %64 = arith.andi %61, %63 : vector<1x16xi1>
    %cst_26 = arith.constant 0.000000e+00 : bf16
    %65 = vector.shape_cast %64 : vector<1x16xi1> to vector<1x16xi1>
    %66 = vector.broadcast %65 : vector<1x16xi1> to vector<32x16xi1>
    %67 = vector.broadcast %cst_26 : bf16 to vector<32x16xbf16>
    %68 = arith.select %66, %58, %67 : vector<32x16xi1>, vector<32x16xbf16>
    %c0_27 = arith.constant 0 : index
    %c0_28 = arith.constant 0 : index
    %69 = vector.load %arg9[%c0_27, %c0_28] : memref<32x96xbf16, #tpu.memory_space<vmem>>, vector<32x96xbf16>
    %c0_29 = arith.constant 0 : index
    %c0_30 = arith.constant 0 : index
    %70 = vector.load %arg10[%c0_29, %c0_30] : memref<32x1xf32, #tpu.memory_space<vmem>>, vector<32x1xf32>
    %71 = vector.extract_strided_slice %68 {offsets = [0, 0], sizes = [32, 8], strides = [1, 1]} : vector<32x16xbf16> to vector<32x8xbf16>
    %72 = vector.extract_strided_slice %68 {offsets = [0, 4], sizes = [32, 8], strides = [1, 1]} : vector<32x16xbf16> to vector<32x8xbf16>
    %73 = vector.extract_strided_slice %68 {offsets = [0, 8], sizes = [32, 8], strides = [1, 1]} : vector<32x16xbf16> to vector<32x8xbf16>
    %74 = tpu.concatenate %71, %72, %73 in 0 : vector<32x8xbf16>, vector<32x8xbf16>, vector<32x8xbf16> -> vector<96x8xbf16>
    %cst_31 = arith.constant dense<0.000000e+00> : vector<32x8xf32>
    %75 = tpu.matmul %69, %74, %cst_31 {dimension_numbers = #tpu.dot_dimension_numbers<[1], [0], [0], [1], [0, 0, 1, 1], [], []>} : vector<32x96xbf16>, vector<96x8xbf16>, vector<32x8xf32> -> vector<32x8xf32>
    %76 = vector.broadcast %70 : vector<32x1xf32> to vector<32x8xf32>
    %77 = arith.addf %75, %76 : vector<32x8xf32>
    %78 = arith.addf %77, %13 : vector<32x8xf32>
    %c0_32 = arith.constant 0 : index
    %c0_33 = arith.constant 0 : index
    %c0_34 = arith.constant 0 : index
    %79 = vector.load %arg11[%c0_32, %c0_33, %c0_34] : memref<1x32x8xf32, #tpu.memory_space<vmem>>, vector<1x32x8xf32>
    %80 = vector.shape_cast %79 : vector<1x32x8xf32> to vector<32x8xf32>
    %81 = vector.shape_cast %78 : vector<32x8xf32> to vector<1x32x8xf32>
    tpu.vector_store %arg11[%c0_32, %c0_33, %c0_34], %81 {strides = array<i32>} : memref<1x32x8xf32, #tpu.memory_space<vmem>>, vector<1x32x8xf32>,
    return
  }
  func.func @transform_0(%arg0: i32, %arg1: i32) -> (i32, i32, i32) {
    %c0_i32 = arith.constant 0 : i32
    %c0_i32_0 = arith.constant 0 : i32
    %c0_i32_1 = arith.constant 0 : i32
    return %arg0, %c0_i32, %c0_i32_0 : i32, i32, i32
  }
  func.func @transform_1(%arg0: i32, %arg1: i32) -> (i32, i32) {
    %c0_i32 = arith.constant 0 : i32
    %c0_i32_0 = arith.constant 0 : i32
    %c0_i32_1 = arith.constant 0 : i32
    return %c0_i32, %c0_i32_0 : i32, i32
  }
  func.func @transform_2(%arg0: i32, %arg1: i32) -> (i32, i32) {
    %c0_i32 = arith.constant 0 : i32
    %c0_i32_0 = arith.constant 0 : i32
    %c0_i32_1 = arith.constant 0 : i32
    return %c0_i32, %c0_i32_0 : i32, i32
  }
  func.func @transform_3(%arg0: i32, %arg1: i32) -> (i32, i32) {
    %c0_i32 = arith.constant 0 : i32
    %c0_i32_0 = arith.constant 0 : i32
    %c0_i32_1 = arith.constant 0 : i32
    return %c0_i32, %c0_i32_0 : i32, i32
  }
  func.func @transform_4(%arg0: i32, %arg1: i32) -> (i32, i32) {
    %c0_i32 = arith.constant 0 : i32
    %c0_i32_0 = arith.constant 0 : i32
    %c0_i32_1 = arith.constant 0 : i32
    return %c0_i32, %c0_i32_0 : i32, i32
  }
  func.func @transform_5(%arg0: i32, %arg1: i32) -> (i32, i32) {
    %c0_i32 = arith.constant 0 : i32
    %c0_i32_0 = arith.constant 0 : i32
    %c0_i32_1 = arith.constant 0 : i32
    return %c0_i32, %c0_i32_0 : i32, i32
  }
  func.func @transform_6(%arg0: i32, %arg1: i32) -> (i32, i32) {
    %c0_i32 = arith.constant 0 : i32
    %c0_i32_0 = arith.constant 0 : i32
    %c0_i32_1 = arith.constant 0 : i32
    return %c0_i32, %c0_i32_0 : i32, i32
  }
  func.func @transform_7(%arg0: i32, %arg1: i32) -> (i32, i32) {
    %c0_i32 = arith.constant 0 : i32
    %c0_i32_0 = arith.constant 0 : i32
    %c0_i32_1 = arith.constant 0 : i32
    return %c0_i32, %c0_i32_0 : i32, i32
  }
  func.func @transform_8(%arg0: i32, %arg1: i32) -> (i32, i32) {
    %c0_i32 = arith.constant 0 : i32
    %c0_i32_0 = arith.constant 0 : i32
    %c0_i32_1 = arith.constant 0 : i32
    return %c0_i32, %c0_i32_0 : i32, i32
  }
  func.func @transform_9(%arg0: i32, %arg1: i32) -> (i32, i32, i32) {
    %c0_i32 = arith.constant 0 : i32
    %c0_i32_0 = arith.constant 0 : i32
    return %arg0, %c0_i32, %arg1 : i32, i32, i32
  }
}

</mosaic_0001>

<bundles_post_ra>
// kernel: tpu_custom_call.1
= control target key start
LH: loop header
LB: loop body
LE: loop exit
PB: predicated region body
PF: predicated region fallthrough
CT: control target
= control target key end

     0   :  { %s1151_s30 = smov 0   ;;  %s1153_s10 = smov 0   ;;  %s1291_s0 = inlined_call_operand.vmem [shape: bf16[2,8,22], index: 0, kind: input, shape index: {}]   ;;  %s1292_s1 = inlined_call_operand.vmem [shape: bf16[32,8], index: 1, kind: input, shape index: {}]   ;;  %s1293_s2 = inlined_call_operand.vmem [shape: f32[32,1], index: 2, kind: input, shape index: {}]   ;;  %s1294_s3 = inlined_call_operand.vmem [shape: bf16[32,24], index: 3, kind: input, shape index: {}]   ;;  %s1295_s4 = inlined_call_operand.vmem [shape: f32[32,1], index: 4, kind: input, shape index: {}]   ;;  %s1296_s5 = inlined_call_operand.vmem [shape: bf16[32,96], index: 5, kind: input, shape index: {}]   ;;  %s1297_s6 = inlined_call_operand.vmem [shape: f32[32,1], index: 6, kind: input, shape index: {}]   ;;  %s1298_s7 = inlined_call_operand.vmem [shape: bf16[32,96], index: 7, kind: input, shape index: {}]   ;;  %s1299_s8 = inlined_call_operand.vmem [shape: f32[32,1], index: 8, kind: input, shape index: {}]   ;;  %s1300_s9 = inlined_call_operand.vmem [shape: f32[2,32,8], index: 9, kind: output, shape index: {}]  }
   0x1   :  { %s1155_s11 = smov 0  }
   0x2 LB: > { %s31_s12 = sadd.s32 1, %s1088_s10  ;;  %p916_p0 = scmp.ge.s32.totalorder %s1092_s11, 1  ;;  %s1092_s11 = sphi %s1155_s11, %s19_s11   ;;  %s1088_s10 = sphi %s1153_s10, %s1302_s10   ;;  %s1084_s30 = sphi %s1151_s30, %s1301_s30  }
   0x3   : > { %p33_p1 = scmp.ge.s32.totalorder %s31_s12, 2  ;;  %p300_p2 = scmp.lt.s32.totalorder %s1092_s11, 3 }
   0x5   : > { %s1304_s12 = smov (%p33_p1, %s31_s12), 0  ;;  %p301_p3 = pnand %p916_p0, %p300_p2 }
   0x6   : > { %p338_p4 = scmp.lt.s32.totalorder (!%p301_p3), %s1084_s30, 1  ;;  %v1061_v0 = vld [vmem:[%s1294_s3] sm:$0xff] (!%p301_p3)   ;;  %vm516_vm0 = vcmask (!%p301_p3), 195584   ;;  %v356_v3 = vlaneseq (!%p301_p3)  ;;  %v1094_v6 = vmov (!%p301_p3), 0   ;;  %v472_v10 = vld [vmem:[%s1295_s4 + $0x8] sm:$0xff] (!%p301_p3)  ;;  %s1095_s23 = smov (!%p301_p3), 127  }
   0x7   : > { %304 = sbr.rel (%p301_p3) target bundleno = 1073 (0x431), region = 56  ;;  %974 = vmatprep.mubr.msk.bf16.mxu1 (!%p301_p3), %vm516_vm0, %v1061_v0  ;;  %v471_v4 = vld [vmem:[%s1295_s4] sm:$0xff] (!%p301_p3)  ;;  %1059 = vset.pattern.permute.xlu1 (!%p301_p3), %v1094_v6  ;;  %v474_v13 = vld [vmem:[%s1295_s4 + $0x18] sm:$0xff] (!%p301_p3)  ;;  %s1096_s26 = smov (!%p301_p3), 126   ;;  %v473_v15 = vld [vmem:[%s1295_s4 + $0x10] sm:$0xff] (!%p301_p3)  ;;  %vm411_vm6 = vcmask (!%p301_p3), 1043456  }
   0x8   : > { %1060 = vset.pattern.permute.xlu0 (!%p301_p3), %v1094_v6  ;;  %v357_v8 = vand.u32 (!%p301_p3), 127, %v356_v3  ;;  %488 = vperm.xlu1 (!%p301_p3), %1059, %v471_v4   ;;  %v591_v9 = vshrl.u32 (!%p301_p3), %v356_v3, 7  ;;  %v1062_v21 = vld [vmem:[%s1294_s3 + $0x8] sm:$0xff] (!%p301_p3)   ;;  %v1063_v43 = vld [vmem:[%s1296_s5] sm:$0xff] (!%p301_p3)   ;;  %vm651_vm10 = vcmask (!%p301_p3), 785408   ;;  %v606_v46 = vld [vmem:[%s1297_s6 + $0x18] sm:$0xff] (!%p301_p3) }
   0x9   : > { %v604_v44 = vld [vmem:[%s1297_s6 + $0x8] sm:$0xff] (!%p301_p3)  ;;  %v603_v45 = vld [vmem:[%s1297_s6] sm:$0xff] (!%p301_p3)  ;;  %v605_v47 = vld [vmem:[%s1297_s6 + $0x10] sm:$0xff] (!%p301_p3)  ;;  %s1098_s25 = smov (!%p301_p3), 121   ;;  %vm404_vm11 = vcmask (!%p301_p3), 64512   ;;  %s1100_s19 = smov (!%p301_p3), 120  }
   0xa   : > { %v360_v11 = vadd.s32 (!%p301_p3), 4294967289, %v357_v8  ;;  %v592_v12 = vsub.s32 (!%p301_p3), 0, %v591_v9  ;;  %v1064_v53 = vld [vmem:[%s1296_s5 + $0x8] sm:$0xff] (!%p301_p3)   ;;  %v1066_v58 = vld [vmem:[%s1292_s1] sm:$0xff] (!%p301_p3)  }
   0xb   : > { %966 = vmatprep.mubr.msk.bf16.mxu0 (!%p301_p3), %vm404_vm11, %v1066_v58  ;;  %v1067_v59 = vld [vmem:[%s1292_s1 + $0x8] sm:$0xff] (!%p301_p3)  }
   0xc   : > { %vm583_vm2 = vcmp.ge.s32.totalorder (!%p301_p3), %v360_v11, 0  ;;  %vm584_vm3 = vcmp.lt.s32.totalorder (!%p301_p3), %v360_v11, 8  ;;  %493 = vperm.xlu1 (!%p301_p3), %1059, %v472_v10  }
   0xd   : > { %vm585_vm4 = vmand (!%p301_p3), %vm583_vm2, %vm584_vm3 }
   0xe   : > { %s1306_s30 = smov (!%p338_p4, %s1084_s30), 1  ;;  %vm588_vm5 = vmpackc.low %vm585_vm4, %vm585_vm4 }
   0xf   : > { %s917_s13 = sshll.u32 %s1306_s30, 2  ;;  %v589_v14 = vsel %vm588_vm5, 65537, %v1094_v6  ;;  %s940_s21 = sshll.u32 %s1306_s30, 5 }
  0x10   : > { %s341_s16 = scalar_lea.vmem %s1291_s0, %s917_s13  ;;  %503 = vperm.xlu1 %1059, %v474_v13   ;;  %v593_v16 = vrot.slane %v589_v14, %v592_v12 }
  0x11   : > { %v1178_v1 = vld [vmem:[%s341_s16] sm:$0xf]  ;;  %s1097_s16 = smov 124  }
  0x12   : > { %vm464_vm1 = vcmp.ge.bf16.partialorder %v1178_v1, 0  ;;  %v465_v2 = vmul.bf16 1045249613, %v1178_v1  ;;  %v922_v48 = vcombine.low %v1178_v1, %v1178_v1 }
  0x14   : > { %v466_v5 = vsel %vm464_vm1, %v1178_v1, %v465_v2  ;;  %594 = vrot.lane.b32.xlu1 %v593_v16, %s1095_s23 }
  0x15   : > { %v925_v7 = vcombine.low %v466_v5, %v466_v5 }
  0x17   : > { %478 = vrot.lane.b32.xlu0 %v925_v7, %s1095_s23 }
  0x1b   : > { %480 = vrot.lane.b32.xlu0 %v925_v7, %s1096_s26 }
  0x1f   : > { %498 = vperm.xlu0 %1060, %v473_v15   ;;  %v1068_v15 = vld [vmem:[%s1298_s7] sm:$0xff]  }
  0x87   : > { %v489_v22 = vpop.permute.xlu1 %488 }
  0x89   : > { %v479_v17 = vpop.permute.xlu0 %478 }
  0x8a   : > { %v484_v18 = vsel %vm411_vm6, %v466_v5, %v479_v17  ;;  %v365_v17 = vld [vmem:[%s1293_s2] sm:$0xff] }
  0x8b   : > { %970 = vmatprep.subr.bf16.mxu1 %v484_v18  ;;  %v494_v23 = vpop.permute.xlu1 %493 }
  0x8c   : > { %971 = vmatpush3.bf16.msra.mxu1 %v484_v18  ;;  %v368_v18 = vld [vmem:[%s1293_s2 + $0x18] sm:$0xff] }
  0x8d   : > { %v481_v19 = vpop.permute.xlu0 %480 }
  0x8e   : > { %1023 = vmatprep.subr.msk.bf16.mxu1 %vm411_vm6, %v481_v19  ;;  %v524_v20 = vsel %vm411_vm6, %v481_v19, 0  ;;  %v367_v19 = vld [vmem:[%s1293_s2 + $0x10] sm:$0xff] }
  0x8f   : > { %v504_v24 = vpop.permute.xlu1 %503 }
  0x90   : > { %973 = vmatpush3.bf16.msra.mxu1 %v524_v20  ;;  %v725_v20 = vld [vmem:[%s1299_s8 + $0x8] sm:$0xff] }
  0x93   : > { %975 = vmatmul.mubr.msk.bf16.vlgmr.msra.gmra.mrb[0].mxu1 %vm516_vm0, %v1062_v21  ;;  %v595_v34 = vpop.permute.xlu1 %594  ;;  %v724_v21 = vld [vmem:[%s1299_s8] sm:$0xff] }
  0x94   : > { %vm596_vm7 = vcmp.ne.s16.totalorder %v595_v34, 0  ;;  %990 = vmatprep.mubr.msk.bf16.mxu1 %vm651_vm10, %v1063_v43 }
  0x9e   : > { %v499_v26 = vpop.permute.xlu0 %498 }
 0x166   : > { %v976_v25 = vpop.f32.mrb[0].mxu1 }
 0x167   : > { %v560_v27 = vpop.f32.mrb[1].mxu1  ;;  %v569_v29 = vadd.f32 %v976_v25, %v499_v26 }
 0x168   : > { %v977_v28 = vpop.f32.mrb[2].mxu1  ;;  %v561_v32 = vadd.f32 %v560_v27, %v489_v22  ;;  %v727_v22 = vld [vmem:[%s1299_s8 + $0x18] sm:$0xff] }
 0x169   : > { %v572_v30 = vadd.f32 %v977_v28, %v504_v24  ;;  %v563_v31 = vpop.f32.mrb[3].mxu1  ;;  %v1069_v28 = vld [vmem:[%s1298_s7 + $0x8] sm:$0xff]  }
 0x16a   : > { %v564_v33 = vadd.f32 %v563_v31, %v494_v23  ;;  %v726_v23 = vld [vmem:[%s1299_s8 + $0x10] sm:$0xff] }
 0x16b   : > { %v576_v35 = vpack.c.bf16 %v572_v30, %v569_v29 }
 0x16c   : > { %v575_v36 = vpack.c.bf16 %v564_v33, %v561_v32 }
 0x16d   : > { %v580_v37 = vmul.bf16 1045249613, %v576_v35  ;;  %vm578_vm8 = vcmp.ge.bf16.partialorder %v576_v35, 0 }
 0x16e   : > { %v579_v38 = vmul.bf16 1045249613, %v575_v36  ;;  %vm577_vm9 = vcmp.ge.bf16.partialorder %v575_v36, 0 }
 0x16f   : > { %v582_v39 = vsel %vm578_vm8, %v576_v35, %v580_v37 }
 0x170   : > { %v581_v40 = vsel %vm577_vm9, %v575_v36, %v579_v38  ;;  %v598_v41 = vsel %vm596_vm7, %v582_v39, 0 }
 0x171   : > { %1024 = vmatprep.subr.msk.bf16.mxu1 %vm596_vm7, %v581_v40  ;;  %611 = vrot.lane.b32.xlu1 %v598_v41, %s1096_s26  ;;  %v597_v42 = vsel %vm596_vm7, %v581_v40, 0 }
 0x172   : > { %609 = vrot.lane.b32.xlu0 %v597_v42, %s1096_s26  ;;  %979 = vmatpush3.bf16.msra.mxu1 %v597_v42  ;;  %s1099_s26 = smov 125  }
 0x173   : > { %1025 = vmatprep.subr.msk.bf16.mxu1 %vm596_vm7, %v582_v39 }
 0x175   : > { %617 = vrot.lane.b32.xlu1 %v598_v41, %s1097_s16 }
 0x176   : > { %615 = vrot.lane.b32.xlu0 %v597_v42, %s1097_s16  ;;  %981 = vmatpush3.bf16.msra.mxu1 %v598_v41 }
 0x179   : > { %628 = vperm.xlu1 %1059, %v604_v44  }
 0x17a   : > { %623 = vperm.xlu0 %1060, %v603_v45  }
 0x17d   : > { %638 = vperm.xlu1 %1059, %v606_v46  }
 0x17e   : > { %633 = vperm.xlu0 %1060, %v605_v47  }
 0x181   : > { %402 = vrot.lane.b32.xlu1 %v922_v48, %s1098_s25 }
 0x182   : > { %715 = vrot.lane.b32.xlu0 %v593_v16, %s1099_s26  ;;  %v366_v16 = vld [vmem:[%s1293_s2 + $0x8] sm:$0xff] }
 0x1e3   : > { %v612_v50 = vpop.permute.xlu1 %611 }
 0x1e4   : > { %v610_v49 = vpop.permute.xlu0 %609 }
 0x1e5   : > { %982 = vmatprep.subr.bf16.mxu1 %v610_v49 }
 0x1e6   : > { %983 = vmatpush3.bf16.msra.mxu1 %v610_v49 }
 0x1e7   : > { %984 = vmatprep.subr.bf16.mxu1 %v612_v50  ;;  %v618_v52 = vpop.permute.xlu1 %617 }
 0x1e8   : > { %v616_v51 = vpop.permute.xlu0 %615 }
 0x1ea   : > { %985 = vmatpush3.bf16.msra.mxu1 %v612_v50 }
 0x1eb   : > { %986 = vmatprep.subr.bf16.mxu1 %v616_v51 }
 0x1ee   : > { %987 = vmatpush3.bf16.msra.mxu1 %v616_v51 }
 0x1ef   : > { %988 = vmatprep.subr.bf16.mxu1 %v618_v52 }
 0x1f2   : > { %989 = vmatpush3.bf16.msra.mxu1 %v618_v52 }
 0x1f5   : > { %991 = vmatmul.mubr.msk.bf16.vlgmr.msra.gmra.mrb[4].mxu1 %vm651_vm10, %v1064_v53 }
 0x1f8   : > { %v629_v54 = vpop.permute.xlu1 %628 }
 0x1f9   : > { %v624_v60 = vpop.permute.xlu0 %623 }
 0x1fc   : > { %v639_v55 = vpop.permute.xlu1 %638 }
 0x1fd   : > { %v634_v61 = vpop.permute.xlu0 %633 }
 0x200   : > { %v403_v56 = vpop.permute.xlu1 %402 }
 0x201   : > { %1022 = vmatprep.subr.msk.bf16.mxu0 %vm411_vm6, %v403_v56  ;;  %v413_v57 = vsel %vm411_vm6, %v403_v56, 0  ;;  %v716_v6 = vpop.permute.xlu0 %715 }
 0x202   : > { %965 = vmatpush3.bf16.msra.mxu0 %v413_v57  ;;  %vm717_vm12 = vcmp.ne.s16.totalorder %v716_v6, 0 }
 0x205   : > { %967 = vmatmul.mubr.msk.bf16.vlgmr.msra.gmra.mrb[0].mxu0 %vm404_vm11, %v1067_v59 }
 0x206   : > { %1006 = vmatprep.mubr.msk.bf16.mxu0 %vm651_vm10, %v1068_v15 }
 0x2c8   : > { %v992_v62 = vpop.f32.mrb[4].mxu1 }
 0x2c9   : > { %v692_v63 = vpop.f32.mrb[5].mxu1  ;;  %v701_v1 = vadd.f32 %v992_v62, %v634_v61 }
 0x2ca   : > { %v993_v0 = vpop.f32.mrb[6].mxu1  ;;  %v693_v4 = vadd.f32 %v692_v63, %v624_v60 }
 0x2cb   : > { %v704_v2 = vadd.f32 %v993_v0, %v639_v55  ;;  %v695_v3 = vpop.f32.mrb[7].mxu1 }
 0x2cc   : > { %v696_v5 = vadd.f32 %v695_v3, %v629_v54 }
 0x2cd   : > { %v708_v7 = vpack.c.bf16 %v704_v2, %v701_v1 }
 0x2ce   : > { %v707_v8 = vpack.c.bf16 %v696_v5, %v693_v4 }
 0x2cf   : > { %v712_v9 = vmul.bf16 1045249613, %v708_v7  ;;  %vm710_vm13 = vcmp.ge.bf16.partialorder %v708_v7, 0 }
 0x2d0   : > { %v711_v10 = vmul.bf16 1045249613, %v707_v8  ;;  %vm709_vm14 = vcmp.ge.bf16.partialorder %v707_v8, 0 }
 0x2d1   : > { %v714_v11 = vsel %vm710_vm13, %v708_v7, %v712_v9 }
 0x2d2   : > { %v719_v12 = vsel %vm717_vm12, %v714_v11, 0  ;;  %v713_v13 = vsel %vm709_vm14, %v707_v8, %v711_v10 }
 0x2d3   : > { %732 = vrot.lane.b32.xlu1 %v719_v12, %s1097_s16  ;;  %1026 = vmatprep.subr.msk.bf16.mxu0 %vm717_vm12, %v713_v13  ;;  %v718_v14 = vsel %vm717_vm12, %v713_v13, 0 }
 0x2d4   : > { %730 = vrot.lane.b32.xlu0 %v718_v14, %s1097_s16  ;;  %995 = vmatpush3.bf16.msra.mxu0 %v718_v14  ;;  %s349_s16 = scalar_lea.vmem %s1300_s9, %s940_s21 }
 0x2d5   : > { %1027 = vmatprep.subr.msk.bf16.mxu0 %vm717_vm12, %v714_v11 }
 0x2d7   : > { %738 = vrot.lane.b32.xlu1 %v719_v12, %s1100_s19 }
 0x2d8   : > { %736 = vrot.lane.b32.xlu0 %v718_v14, %s1100_s19  ;;  %997 = vmatpush3.bf16.msra.mxu0 %v719_v12 }
 0x2db   : > { %376 = vperm.xlu1 %1059, %v366_v16  }
 0x2dc   : > { %371 = vperm.xlu0 %1060, %v365_v17  }
 0x2df   : > { %386 = vperm.xlu1 %1059, %v368_v18  }
 0x2e0   : > { %381 = vperm.xlu0 %1060, %v367_v19  }
 0x2e3   : > { %749 = vperm.xlu1 %1059, %v725_v20  }
 0x2e4   : > { %744 = vperm.xlu0 %1060, %v724_v21  }
 0x2e7   : > { %759 = vperm.xlu1 %1059, %v727_v22  }
 0x2e8   : > { %754 = vperm.xlu0 %1060, %v726_v23  }
 0x345   : > { %v733_v25 = vpop.permute.xlu1 %732 }
 0x346   : > { %v731_v24 = vpop.permute.xlu0 %730 }
 0x347   : > { %998 = vmatprep.subr.bf16.mxu0 %v731_v24 }
 0x348   : > { %999 = vmatpush3.bf16.msra.mxu0 %v731_v24 }
 0x349   : > { %1000 = vmatprep.subr.bf16.mxu0 %v733_v25  ;;  %v739_v27 = vpop.permute.xlu1 %738 }
 0x34a   : > { %v737_v26 = vpop.permute.xlu0 %736 }
 0x34c   : > { %1001 = vmatpush3.bf16.msra.mxu0 %v733_v25 }
 0x34d   : > { %1002 = vmatprep.subr.bf16.mxu0 %v737_v26 }
 0x350   : > { %1003 = vmatpush3.bf16.msra.mxu0 %v737_v26 }
 0x351   : > { %1004 = vmatprep.subr.bf16.mxu0 %v739_v27 }
 0x354   : > { %1005 = vmatpush3.bf16.msra.mxu0 %v739_v27 }
 0x357   : > { %1007 = vmatmul.mubr.msk.bf16.vlgmr.msra.gmra.mrb[0].mxu0 %vm651_vm10, %v1069_v28 }
 0x35a   : > { %v377_v30 = vpop.permute.xlu1 %376 }
 0x35b   : > { %v372_v29 = vpop.permute.xlu0 %371 }
 0x35e   : > { %v387_v32 = vpop.permute.xlu1 %386 }
 0x35f   : > { %v382_v31 = vpop.permute.xlu0 %381 }
 0x362   : > { %v750_v34 = vpop.permute.xlu1 %749 }
 0x363   : > { %v745_v33 = vpop.permute.xlu0 %744  ;;  %v1016_v43 = vadd.f32 %v750_v34, %v377_v30 }
 0x364   : > { %v1012_v38 = vadd.f32 %v745_v33, %v372_v29 }
 0x366   : > { %v760_v36 = vpop.permute.xlu1 %759 }
 0x367   : > { %v755_v35 = vpop.permute.xlu0 %754  ;;  %v1014_v40 = vadd.f32 %v760_v36, %v387_v32 }
 0x368   : > { %v1010_v37 = vadd.f32 %v755_v35, %v382_v31 }
 0x42a   : > { %v1008_v39 = vpop.f32.mrb[0].mxu0 }
 0x42b   : > { %v1011_v41 = vadd.f32 %v1010_v37, %v1008_v39  ;;  %v812_v42 = vpop.f32.mrb[1].mxu0 }
 0x42c   : > { %v1013_v44 = vadd.f32 %v1012_v38, %v812_v42  ;;  %v1009_v45 = vpop.f32.mrb[2].mxu0 }
 0x42d   : > { %833 = vst.msk [vmem:[%s349_s16 + $0x10] sm:$0xff] %vm404_vm11, %v1011_v41  ;;  %v1015_v46 = vadd.f32 %v1014_v40, %v1009_v45  ;;  %v815_v47 = vpop.f32.mrb[3].mxu0 }
 0x42e   : > { %831 = vst.msk [vmem:[%s349_s16] sm:$0xff] %vm404_vm11, %v1013_v44  ;;  %v1017_v48 = vadd.f32 %v1016_v43, %v815_v47 }
 0x42f   : > { %834 = vst.msk [vmem:[%s349_s16 + $0x18] sm:$0xff] %vm404_vm11, %v1015_v46 }
 0x430   : > { %832 = vst.msk [vmem:[%s349_s16 + $0x8] sm:$0xff] %vm404_vm11, %v1017_v48 }
 0x431 PF: > { %s19_s11 = sadd.s32 1, %s1092_s11   ;;  %s1301_s30 = smov %s1088_s10 }
 0x432   : > { %p16_p5 = scmp.ge.s32.totalorder %s19_s11, 4   ;;  %s1302_s10 = smov %s1304_s12 }
 0x434   :  { %18 = sbr.rel (!%p16_p5) target bundleno = 2 (0x2), region = 86 }

</bundles_post_ra>
